<compile_context>
chip_gen: v7x
topology: tpu7x:2x2x1
jax: 0.10.0
libtpu: 0.0.40
codegen_flags: <defaults>
</compile_context>

<pallas_src>
import jax
import jax.numpy as jnp
from jax.experimental import pallas as pl
from jax.experimental.pallas import tpu as pltpu

B_BIAS = -0.1   # ModReLU.__init__ sets self.b = -0.1 (deterministic, in-script)
EPS = 1e-8

LANE = 128
ROW_TILE_MAX = 4096          # (2, 4096, 128) f32 = 4 MiB per block
SINGLE_BLOCK_ROWS = 2048     # above this, force >= 2 grid steps (v7x: 2 TCs)
VMEM_LIMIT_BYTES = 32 << 20  # 16 MiB double-buffered footprint + headroom;
                             # needed on v5e (16 MiB default scoped limit),
                             # safe on v6e (128 MiB) and v7x (64 MiB) physical.


def _round_up(x: int, m: int) -> int:
    return ((x + m - 1) // m) * m


def modrelu_kernel(x_ref, o_ref):
    # x_ref block: (2, row_tile, 128) -- plane 0 = real, plane 1 = imag.
    re = x_ref[0]
    im = x_ref[1]
    r = jnp.sqrt(re * re + im * im)
    # Acts only on the magnitude, keeps the phase (scale >= 0).
    scale = jnp.maximum(r + B_BIAS, 0.0) / (r + EPS)
    o_ref[0] = scale * re
    o_ref[1] = scale * im


@jax.jit
def modrelu(z: jax.Array) -> jax.Array:
    """Apply modReLU to a complex64 array of arbitrary shape."""
    orig_shape = z.shape
    n = z.size

    # complex64 -> packed f32 planes (2, rows, 128); with allow_input_fusion
    # this producer fusion is folded into the kernel's input DMA pipeline.
    re = jnp.real(z).astype(jnp.float32).reshape(-1)
    im = jnp.imag(z).astype(jnp.float32).reshape(-1)
    packed = jnp.stack([re, im], axis=0)                  # (2, n)
    pad = (-n) % LANE
    if pad:
        packed = jnp.pad(packed, ((0, 0), (0, pad)))      # zeros; tail sliced off below
    rows = (n + pad) // LANE
    x = packed.reshape(2, rows, LANE)

    if rows <= SINGLE_BLOCK_ROWS:
        # Single full-array block: no pipelining / per-step overhead.
        row_tile = rows
    else:
        # Balanced split: at least 2 blocks (keeps both v7x TCs busy), each
        # block <= 4 MiB, row_tile a multiple of 8 to satisfy (8,128) tiling.
        n_blocks = max(2, pl.cdiv(rows, ROW_TILE_MAX))
        row_tile = min(ROW_TILE_MAX, _round_up(pl.cdiv(rows, n_blocks), 8))
    grid = (pl.cdiv(rows, row_tile),)
    spec = pl.BlockSpec((2, row_tile, LANE), lambda i: (0, i, 0))

    out = pl.pallas_call(
        modrelu_kernel,
        out_shape=jax.ShapeDtypeStruct((2, rows, LANE), jnp.float32),
        grid=grid,
        in_specs=[spec],
        out_specs=spec,
        compiler_params=pltpu.CompilerParams(
            dimension_semantics=("parallel",),
            allow_input_fusion=[True],
            vmem_limit_bytes=VMEM_LIMIT_BYTES,
        ),
    )(x)

    # One fused pass: packed f32 planes -> complex64 of the original shape.
    out_flat = out.reshape(2, rows * LANE)[:, :n]
    out_re = out_flat[0].reshape(orig_shape)
    out_im = out_flat[1].reshape(orig_shape)
    return jax.lax.complex(out_re, out_im)


def modrelu_ref(z: jax.Array) -> jax.Array:
    """Pure-JAX reference matching the PyTorch forward exactly."""
    r = jnp.abs(z)
    out = jax.nn.relu(r + B_BIAS)
    return (out * (z / (r + EPS))).astype(jnp.complex64)


def _make_input(key, shape):
    kre, kim = jax.random.split(key)
    re = jax.random.normal(kre, shape, dtype=jnp.float32)
    im = jax.random.normal(kim, shape, dtype=jnp.float32)
    return (re + 1j * im).astype(jnp.complex64)


if __name__ == "__main__":
    key = jax.random.PRNGKey(0)
    k1, k2, k3 = jax.random.split(key, 3)

    # Small NCHW-style input (what the module's forward implies): single-block path.
    z_small = _make_input(k1, (2, 4, 16, 16))
    out_small = jax.block_until_ready(modrelu(z_small))
    ref_small = modrelu_ref(z_small)
    assert out_small.shape == z_small.shape and out_small.dtype == jnp.complex64
    assert jnp.allclose(out_small, ref_small, atol=1e-5, rtol=1e-5)

    # Medium input with a ragged lane pad: still the single-block path.
    z_med = _make_input(k2, (2, 8, 96, 96))
    out_med = jax.block_until_ready(modrelu(z_med))
    ref_med = modrelu_ref(z_med)
    assert out_med.shape == z_med.shape and out_med.dtype == jnp.complex64
    assert jnp.allclose(out_med, ref_med, atol=1e-5, rtol=1e-5)

    # Larger input: exercises the multi-block (grid >= 2, megacore) path.
    z_big = _make_input(k3, (4, 8, 128, 128))
    out_big = jax.block_until_ready(modrelu(z_big))
    ref_big = modrelu_ref(z_big)
    assert out_big.shape == z_big.shape and out_big.dtype == jnp.complex64
    assert jnp.allclose(out_big, ref_big, atol=1e-5, rtol=1e-5)

    print("KERNEL_OK")
</pallas_src>

<mosaic_0001>
module attributes {stable_mosaic.version = 11 : i64} {
  func.func @modrelu_kernel(%arg0: i32, %arg1: memref<2x16x128xf32, #tpu.memory_space<vmem>>, %arg2: memref<2x16x128xf32, #tpu.memory_space<vmem>>) attributes {dimension_semantics = [#tpu.dimension_semantics<parallel>], iteration_bounds = array<i64: 1>, scalar_prefetch = 0 : i64, scratch_operands = 0 : i64, tpu.core_type = #tpu.core_type<tc>, window_params = [{transform_indices = @transform_0, window_bounds = array<i64: 2, 16, 128>}, {transform_indices = @transform_1, window_bounds = array<i64: 2, 16, 128>}]} {
    %c0 = arith.constant 0 : index
    %c0_0 = arith.constant 0 : index
    %c0_1 = arith.constant 0 : index
    %0 = vector.load %arg1[%c0, %c0_0, %c0_1] : memref<2x16x128xf32, #tpu.memory_space<vmem>>, vector<1x16x128xf32>
    %1 = vector.shape_cast %0 : vector<1x16x128xf32> to vector<16x128xf32>
    %c1 = arith.constant 1 : index
    %c0_2 = arith.constant 0 : index
    %c0_3 = arith.constant 0 : index
    %2 = vector.load %arg1[%c1, %c0_2, %c0_3] : memref<2x16x128xf32, #tpu.memory_space<vmem>>, vector<1x16x128xf32>
    %3 = vector.shape_cast %2 : vector<1x16x128xf32> to vector<16x128xf32>
    %4 = arith.mulf %1, %1 : vector<16x128xf32>
    %5 = arith.mulf %3, %3 : vector<16x128xf32>
    %6 = arith.addf %4, %5 : vector<16x128xf32>
    %7 = math.sqrt %6 : vector<16x128xf32>
    %cst = arith.constant -1.000000e-01 : f32
    %8 = vector.broadcast %cst : f32 to vector<16x128xf32>
    %9 = arith.addf %7, %8 : vector<16x128xf32>
    %cst_4 = arith.constant 0.000000e+00 : f32
    %10 = vector.broadcast %cst_4 : f32 to vector<16x128xf32>
    %11 = arith.maximumf %9, %10 : vector<16x128xf32>
    %cst_5 = arith.constant 9.99999993E-9 : f32
    %12 = vector.broadcast %cst_5 : f32 to vector<16x128xf32>
    %13 = arith.addf %7, %12 : vector<16x128xf32>
    %14 = arith.divf %11, %13 : vector<16x128xf32>
    %15 = arith.mulf %14, %1 : vector<16x128xf32>
    %c0_6 = arith.constant 0 : index
    %c0_7 = arith.constant 0 : index
    %c0_8 = arith.constant 0 : index
    %16 = vector.load %arg2[%c0_6, %c0_7, %c0_8] : memref<2x16x128xf32, #tpu.memory_space<vmem>>, vector<1x16x128xf32>
    %17 = vector.shape_cast %16 : vector<1x16x128xf32> to vector<16x128xf32>
    %18 = vector.shape_cast %15 : vector<16x128xf32> to vector<1x16x128xf32>
    tpu.vector_store %arg2[%c0_6, %c0_7, %c0_8], %18 {strides = array<i32>} : memref<2x16x128xf32, #tpu.memory_space<vmem>>, vector<1x16x128xf32>,
    %19 = arith.mulf %14, %3 : vector<16x128xf32>
    %c1_9 = arith.constant 1 : index
    %c0_10 = arith.constant 0 : index
    %c0_11 = arith.constant 0 : index
    %20 = vector.load %arg2[%c1_9, %c0_10, %c0_11] : memref<2x16x128xf32, #tpu.memory_space<vmem>>, vector<1x16x128xf32>
    %21 = vector.shape_cast %20 : vector<1x16x128xf32> to vector<16x128xf32>
    %22 = vector.shape_cast %19 : vector<16x128xf32> to vector<1x16x128xf32>
    tpu.vector_store %arg2[%c1_9, %c0_10, %c0_11], %22 {strides = array<i32>} : memref<2x16x128xf32, #tpu.memory_space<vmem>>, vector<1x16x128xf32>,
    return
  }
  func.func @transform_0(%arg0: i32) -> (i32, i32, i32) {
    %c0_i32 = arith.constant 0 : i32
    %c0_i32_0 = arith.constant 0 : i32
    %c0_i32_1 = arith.constant 0 : i32
    return %c0_i32, %arg0, %c0_i32_0 : i32, i32, i32
  }
  func.func @transform_1(%arg0: i32) -> (i32, i32, i32) {
    %c0_i32 = arith.constant 0 : i32
    %c0_i32_0 = arith.constant 0 : i32
    %c0_i32_1 = arith.constant 0 : i32
    return %c0_i32, %arg0, %c0_i32_0 : i32, i32, i32
  }
}

</mosaic_0001>

<bundles_post_ra>
// kernel: custom-call
= control target key start
LH: loop header
LB: loop body
LE: loop exit
PB: predicated region body
PF: predicated region fallthrough
CT: control target
= control target key end

     0   :  { %2 = vsyncpa [#allocation0], 0  ;;  %s61_s0 = inlined_call_operand.hbm [shape: c64[2,4,16,16], index: 0, kind: input, shape index: {}]   ;;  %s62_s1 = inlined_call_operand.vmem [shape: f32[2,4,16,16], index: 1, kind: output, shape index: {}]  }
   0x1   :  { %s3_s8 = sshll.u32 %s62_s1, 4  ;;  %s9_s11 = scalar_lea.hbm %s61_s0, 2048  ;;  %s4_s8 = int_to_ptr.vmem [resolvable:$true] %s3_s8 }
   0x2   :  { %p10_p0 = scmp.ne.s32.totalorder %s61_s0, %s9_s11  ;;  %s11_s16 = scalar_lea.hbm %s61_s0, 4096 }
   0x3   :  { %p12_p1 = scmp.lt.u32.totalorder %s11_s16, %s9_s11  ;;  %p13_p2 = scmp.lt.u32.totalorder %s9_s11, %s61_s0 }
   0x5   :  { %p14_p3 = por %p13_p2, %p12_p1 }
   0x7   :  { %p15_p4 = pnand %p14_p3, %p10_p0 }
   0x9   :  { %18 = shalt.err (!%p15_p4)  }
   0xa   :  { %s19_s1 = scalar_lea.vmem %s4_s8, 2048  ;;  %p24_p6 = scmp.lt.s32.totalorder %s4_s8, %s4_s8 }
   0xb   :  { %p20_p5 = scmp.ne.s32.totalorder %s4_s8, %s19_s1  ;;  %p25_p7 = scmp.lt.s32.totalorder %s19_s1, %s19_s1 }
   0xd   :  { %p26_p8 = por %p25_p7, %p24_p6 }
   0xf   :  { %p27_p9 = pnand %p26_p8, %p20_p5 }
  0x11   :  { %30 = shalt.err (!%p27_p9)  }
  0x12   :  { %6 = dma.hbm_to_vmem [thread:$0]  %s61_s0, 2048, %s4_s8, [#allocation0] }
  0x13   :  { %31 = dma.done.wait [#allocation0], 2048  }
  0x14   :  { %32 = vsyncadd [#allocation0], 4294965248 }
  0x15   :  { %8 = vsyncpa [#allocation0], 1 }

// kernel: custom-call.1
= control target key start
LH: loop header
LB: loop body
LE: loop exit
PB: predicated region body
PF: predicated region fallthrough
CT: control target
= control target key end

     0   :  { %s59_s0 = inlined_call_operand.hbm [shape: c64[2,4,16,16], index: 0, kind: input, shape index: {}]   ;;  %s60_s1 = inlined_call_operand.vmem [shape: f32[2,4,16,16], index: 1, kind: output, shape index: {}]  }
   0x1   :  { %s2_s8 = scalar_lea.hbm %s59_s0, 2048 }
   0x2   :  { %3 = vsyncpa [#allocation0], 0  ;;  %s4_s11 = sshll.u32 %s60_s1, 4  ;;  %s34_s14 = scalar_lea.hbm %s59_s0, 4096  ;;  %s5_s11 = int_to_ptr.vmem [resolvable:$true] %s4_s11 }
   0x3   :  { %p11_p0 = scmp.ne.s32.totalorder %s2_s8, %s34_s14  ;;  %p13_p1 = scmp.lt.u32.totalorder %s2_s8, %s59_s0 }
   0x4   :  { %p14_p2 = scmp.lt.u32.totalorder %s34_s14, %s34_s14  ;;  %p16_p4 = scmp.lt.u32.totalorder %s34_s14, %s2_s8 }
   0x6   :  { %p15_p3 = por %p14_p2, %p13_p1 }
   0x8   :  { %p17_p5 = por %p16_p4, %p15_p3 }
   0xa   :  { %p18_p6 = pnand %p17_p5, %p11_p0 }
   0xc   :  { %21 = shalt.err (!%p18_p6)  }
   0xd   :  { %s22_s17 = scalar_lea.vmem %s5_s11, 2048  ;;  %p27_p8 = scmp.lt.s32.totalorder %s5_s11, %s5_s11 }
   0xe   :  { %p23_p7 = scmp.ne.s32.totalorder %s5_s11, %s22_s17  ;;  %p28_p9 = scmp.lt.s32.totalorder %s22_s17, %s22_s17 }
  0x10   :  { %p29_p10 = por %p28_p9, %p27_p8 }
  0x12   :  { %p30_p11 = pnand %p29_p10, %p23_p7 }
  0x14   :  { %33 = shalt.err (!%p30_p11)  }
  0x15   :  { %7 = dma.hbm_to_vmem [thread:$0]  %s2_s8, 2048, %s5_s11, [#allocation0] }
  0x16   :  { %35 = dma.done.wait [#allocation0], 2048  }
  0x17   :  { %36 = vsyncadd [#allocation0], 4294965248 }
  0x18   :  { %9 = vsyncpa [#allocation0], 1 }

// kernel: squeeze.3
= control target key start
LH: loop header
LB: loop body
LE: loop exit
PB: predicated region body
PF: predicated region fallthrough
CT: control target
= control target key end

     0   :  { %vm3_vm0 = vcmask 130048   ;;  %s178_s10 = smov 112   ;;  %s179_s19 = smov 80   ;;  %s328_s0 = inlined_call_operand.vmem [shape: f32[2048], index: 0, kind: input, shape index: {}]   ;;  %s329_s1 = inlined_call_operand.vmem [shape: f32[2,4,16,16], index: 1, kind: output, shape index: {}]  }
   0x1   :  { %v30_v0 = vld [vmem:[%s328_s0] sm:$0xff]   ;;  %v142_v1 = vld [vmem:[%s328_s0 + $0x8] sm:$0xff]   ;;  %s177_s0 = smov 96   ;;  %s180_s20 = smov 64  }
   0x2   :  { %31 = vrot.lane.b32.xlu1 %v30_v0, %s177_s0  ;;  %14 = vrot.lane.b32.xlu0 %v30_v0, %s178_s10  ;;  %4 = vst.msk [vmem:[%s329_s1] ss:$8 sm:$0xf] %vm3_vm0, %v30_v0   ;;  %5 = vst.msk [vmem:[%s329_s1] ss:$8 sm:$0xf0] %vm3_vm0, %v30_v0  }
   0x3   :  { %133 = vst.msk [vmem:[%s329_s1 + $0x40] ss:$8 sm:$0xf] %vm3_vm0, %v142_v1   ;;  %134 = vst.msk [vmem:[%s329_s1 + $0x40] ss:$8 sm:$0xf0] %vm3_vm0, %v142_v1  }
   0x4   :  { %s181_s21 = smov 48   ;;  %s182_s22 = smov 32  }
   0x5   :  { %s183_s23 = smov 16  }
   0x6   :  { %40 = vrot.lane.b32.xlu1 %v142_v1, %s177_s0  ;;  %23 = vrot.lane.b32.xlu0 %v142_v1, %s178_s10 }
   0xa   :  { %57 = vrot.lane.b32.xlu1 %v142_v1, %s179_s19  ;;  %48 = vrot.lane.b32.xlu0 %v30_v0, %s179_s19 }
   0xe   :  { %74 = vrot.lane.b32.xlu1 %v142_v1, %s180_s20  ;;  %65 = vrot.lane.b32.xlu0 %v30_v0, %s180_s20 }
  0x12   :  { %91 = vrot.lane.b32.xlu1 %v142_v1, %s181_s21  ;;  %82 = vrot.lane.b32.xlu0 %v30_v0, %s181_s21 }
  0x16   :  { %108 = vrot.lane.b32.xlu1 %v142_v1, %s182_s22  ;;  %99 = vrot.lane.b32.xlu0 %v30_v0, %s182_s22 }
  0x1a   :  { %125 = vrot.lane.b32.xlu1 %v142_v1, %s183_s23  ;;  %116 = vrot.lane.b32.xlu0 %v30_v0, %s183_s23 }
  0x74   :  { %v32_v2 = vpop.permute.xlu1 %31   ;;  %v15_v3 = vpop.permute.xlu0 %14  }
  0x75   :  { %140 = vst.msk [vmem:[%s329_s1 + $0x2] ss:$8 sm:$0xf] %vm3_vm0, %v32_v2   ;;  %141 = vst.msk [vmem:[%s329_s1 + $0x2] ss:$8 sm:$0xf0] %vm3_vm0, %v32_v2  }
  0x76   :  { %135 = vst.msk [vmem:[%s329_s1 + $0x1] ss:$8 sm:$0xf] %vm3_vm0, %v15_v3   ;;  %136 = vst.msk [vmem:[%s329_s1 + $0x1] ss:$8 sm:$0xf0] %vm3_vm0, %v15_v3  }
  0x78   :  { %v41_v4 = vpop.permute.xlu1 %40   ;;  %v24_v5 = vpop.permute.xlu0 %23  }
  0x79   :  { %143 = vst.msk [vmem:[%s329_s1 + $0x42] ss:$8 sm:$0xf] %vm3_vm0, %v41_v4   ;;  %144 = vst.msk [vmem:[%s329_s1 + $0x42] ss:$8 sm:$0xf0] %vm3_vm0, %v41_v4  }
  0x7a   :  { %138 = vst.msk [vmem:[%s329_s1 + $0x41] ss:$8 sm:$0xf] %vm3_vm0, %v24_v5   ;;  %139 = vst.msk [vmem:[%s329_s1 + $0x41] ss:$8 sm:$0xf0] %vm3_vm0, %v24_v5  }
  0x7c   :  { %v58_v6 = vpop.permute.xlu1 %57   ;;  %v49_v7 = vpop.permute.xlu0 %48  }
  0x7d   :  { %148 = vst.msk [vmem:[%s329_s1 + $0x43] ss:$8 sm:$0xf] %vm3_vm0, %v58_v6   ;;  %149 = vst.msk [vmem:[%s329_s1 + $0x43] ss:$8 sm:$0xf0] %vm3_vm0, %v58_v6  }
  0x7e   :  { %145 = vst.msk [vmem:[%s329_s1 + $0x3] ss:$8 sm:$0xf] %vm3_vm0, %v49_v7   ;;  %146 = vst.msk [vmem:[%s329_s1 + $0x3] ss:$8 sm:$0xf0] %vm3_vm0, %v49_v7  }
  0x80   :  { %v75_v8 = vpop.permute.xlu1 %74   ;;  %v66_v9 = vpop.permute.xlu0 %65  }
  0x81   :  { %153 = vst.msk [vmem:[%s329_s1 + $0x44] ss:$8 sm:$0xf] %vm3_vm0, %v75_v8   ;;  %154 = vst.msk [vmem:[%s329_s1 + $0x44] ss:$8 sm:$0xf0] %vm3_vm0, %v75_v8  }
  0x82   :  { %150 = vst.msk [vmem:[%s329_s1 + $0x4] ss:$8 sm:$0xf] %vm3_vm0, %v66_v9   ;;  %151 = vst.msk [vmem:[%s329_s1 + $0x4] ss:$8 sm:$0xf0] %vm3_vm0, %v66_v9  }
  0x84   :  { %v92_v10 = vpop.permute.xlu1 %91   ;;  %v83_v11 = vpop.permute.xlu0 %82  }
  0x85   :  { %158 = vst.msk [vmem:[%s329_s1 + $0x45] ss:$8 sm:$0xf] %vm3_vm0, %v92_v10   ;;  %159 = vst.msk [vmem:[%s329_s1 + $0x45] ss:$8 sm:$0xf0] %vm3_vm0, %v92_v10  }
  0x86   :  { %155 = vst.msk [vmem:[%s329_s1 + $0x5] ss:$8 sm:$0xf] %vm3_vm0, %v83_v11   ;;  %156 = vst.msk [vmem:[%s329_s1 + $0x5] ss:$8 sm:$0xf0] %vm3_vm0, %v83_v11  }
  0x88   :  { %v109_v12 = vpop.permute.xlu1 %108   ;;  %v100_v13 = vpop.permute.xlu0 %99  }
  0x89   :  { %163 = vst.msk [vmem:[%s329_s1 + $0x46] ss:$8 sm:$0xf] %vm3_vm0, %v109_v12   ;;  %164 = vst.msk [vmem:[%s329_s1 + $0x46] ss:$8 sm:$0xf0] %vm3_vm0, %v109_v12  }
  0x8a   :  { %160 = vst.msk [vmem:[%s329_s1 + $0x6] ss:$8 sm:$0xf] %vm3_vm0, %v100_v13   ;;  %161 = vst.msk [vmem:[%s329_s1 + $0x6] ss:$8 sm:$0xf0] %vm3_vm0, %v100_v13  }
  0x8c   :  { %v126_v14 = vpop.permute.xlu1 %125   ;;  %v117_v15 = vpop.permute.xlu0 %116  }
  0x8d   :  { %168 = vst.msk [vmem:[%s329_s1 + $0x47] ss:$8 sm:$0xf] %vm3_vm0, %v126_v14   ;;  %169 = vst.msk [vmem:[%s329_s1 + $0x47] ss:$8 sm:$0xf0] %vm3_vm0, %v126_v14  }
  0x8e   :  { %165 = vst.msk [vmem:[%s329_s1 + $0x7] ss:$8 sm:$0xf] %vm3_vm0, %v117_v15   ;;  %166 = vst.msk [vmem:[%s329_s1 + $0x7] ss:$8 sm:$0xf0] %vm3_vm0, %v117_v15  }

// kernel: squeeze.2
= control target key start
LH: loop header
LB: loop body
LE: loop exit
PB: predicated region body
PF: predicated region fallthrough
CT: control target
= control target key end

     0   :  { %vm3_vm0 = vcmask 130048   ;;  %s178_s10 = smov 112   ;;  %s179_s19 = smov 80   ;;  %s328_s0 = inlined_call_operand.vmem [shape: f32[1,16,128], index: 0, kind: input, shape index: {}]   ;;  %s329_s1 = inlined_call_operand.vmem [shape: f32[2,4,16,16], index: 1, kind: output, shape index: {}]  }
   0x1   :  { %v30_v0 = vld [vmem:[%s328_s0] sm:$0xff]   ;;  %v142_v1 = vld [vmem:[%s328_s0 + $0x8] sm:$0xff]   ;;  %s177_s0 = smov 96   ;;  %s180_s20 = smov 64  }
   0x2   :  { %31 = vrot.lane.b32.xlu1 %v30_v0, %s177_s0  ;;  %14 = vrot.lane.b32.xlu0 %v30_v0, %s178_s10  ;;  %4 = vst.msk [vmem:[%s329_s1] ss:$8 sm:$0xf] %vm3_vm0, %v30_v0   ;;  %5 = vst.msk [vmem:[%s329_s1] ss:$8 sm:$0xf0] %vm3_vm0, %v30_v0  }
   0x3   :  { %133 = vst.msk [vmem:[%s329_s1 + $0x40] ss:$8 sm:$0xf] %vm3_vm0, %v142_v1   ;;  %134 = vst.msk [vmem:[%s329_s1 + $0x40] ss:$8 sm:$0xf0] %vm3_vm0, %v142_v1  }
   0x4   :  { %s181_s21 = smov 48   ;;  %s182_s22 = smov 32  }
   0x5   :  { %s183_s23 = smov 16  }
   0x6   :  { %40 = vrot.lane.b32.xlu1 %v142_v1, %s177_s0  ;;  %23 = vrot.lane.b32.xlu0 %v142_v1, %s178_s10 }
   0xa   :  { %57 = vrot.lane.b32.xlu1 %v142_v1, %s179_s19  ;;  %48 = vrot.lane.b32.xlu0 %v30_v0, %s179_s19 }
   0xe   :  { %74 = vrot.lane.b32.xlu1 %v142_v1, %s180_s20  ;;  %65 = vrot.lane.b32.xlu0 %v30_v0, %s180_s20 }
  0x12   :  { %91 = vrot.lane.b32.xlu1 %v142_v1, %s181_s21  ;;  %82 = vrot.lane.b32.xlu0 %v30_v0, %s181_s21 }
  0x16   :  { %108 = vrot.lane.b32.xlu1 %v142_v1, %s182_s22  ;;  %99 = vrot.lane.b32.xlu0 %v30_v0, %s182_s22 }
  0x1a   :  { %125 = vrot.lane.b32.xlu1 %v142_v1, %s183_s23  ;;  %116 = vrot.lane.b32.xlu0 %v30_v0, %s183_s23 }
  0x74   :  { %v32_v2 = vpop.permute.xlu1 %31   ;;  %v15_v3 = vpop.permute.xlu0 %14  }
  0x75   :  { %140 = vst.msk [vmem:[%s329_s1 + $0x2] ss:$8 sm:$0xf] %vm3_vm0, %v32_v2   ;;  %141 = vst.msk [vmem:[%s329_s1 + $0x2] ss:$8 sm:$0xf0] %vm3_vm0, %v32_v2  }
  0x76   :  { %135 = vst.msk [vmem:[%s329_s1 + $0x1] ss:$8 sm:$0xf] %vm3_vm0, %v15_v3   ;;  %136 = vst.msk [vmem:[%s329_s1 + $0x1] ss:$8 sm:$0xf0] %vm3_vm0, %v15_v3  }
  0x78   :  { %v41_v4 = vpop.permute.xlu1 %40   ;;  %v24_v5 = vpop.permute.xlu0 %23  }
  0x79   :  { %143 = vst.msk [vmem:[%s329_s1 + $0x42] ss:$8 sm:$0xf] %vm3_vm0, %v41_v4   ;;  %144 = vst.msk [vmem:[%s329_s1 + $0x42] ss:$8 sm:$0xf0] %vm3_vm0, %v41_v4  }
  0x7a   :  { %138 = vst.msk [vmem:[%s329_s1 + $0x41] ss:$8 sm:$0xf] %vm3_vm0, %v24_v5   ;;  %139 = vst.msk [vmem:[%s329_s1 + $0x41] ss:$8 sm:$0xf0] %vm3_vm0, %v24_v5  }
  0x7c   :  { %v58_v6 = vpop.permute.xlu1 %57   ;;  %v49_v7 = vpop.permute.xlu0 %48  }
  0x7d   :  { %148 = vst.msk [vmem:[%s329_s1 + $0x43] ss:$8 sm:$0xf] %vm3_vm0, %v58_v6   ;;  %149 = vst.msk [vmem:[%s329_s1 + $0x43] ss:$8 sm:$0xf0] %vm3_vm0, %v58_v6  }
  0x7e   :  { %145 = vst.msk [vmem:[%s329_s1 + $0x3] ss:$8 sm:$0xf] %vm3_vm0, %v49_v7   ;;  %146 = vst.msk [vmem:[%s329_s1 + $0x3] ss:$8 sm:$0xf0] %vm3_vm0, %v49_v7  }
  0x80   :  { %v75_v8 = vpop.permute.xlu1 %74   ;;  %v66_v9 = vpop.permute.xlu0 %65  }
  0x81   :  { %153 = vst.msk [vmem:[%s329_s1 + $0x44] ss:$8 sm:$0xf] %vm3_vm0, %v75_v8   ;;  %154 = vst.msk [vmem:[%s329_s1 + $0x44] ss:$8 sm:$0xf0] %vm3_vm0, %v75_v8  }
  0x82   :  { %150 = vst.msk [vmem:[%s329_s1 + $0x4] ss:$8 sm:$0xf] %vm3_vm0, %v66_v9   ;;  %151 = vst.msk [vmem:[%s329_s1 + $0x4] ss:$8 sm:$0xf0] %vm3_vm0, %v66_v9  }
  0x84   :  { %v92_v10 = vpop.permute.xlu1 %91   ;;  %v83_v11 = vpop.permute.xlu0 %82  }
  0x85   :  { %158 = vst.msk [vmem:[%s329_s1 + $0x45] ss:$8 sm:$0xf] %vm3_vm0, %v92_v10   ;;  %159 = vst.msk [vmem:[%s329_s1 + $0x45] ss:$8 sm:$0xf0] %vm3_vm0, %v92_v10  }
  0x86   :  { %155 = vst.msk [vmem:[%s329_s1 + $0x5] ss:$8 sm:$0xf] %vm3_vm0, %v83_v11   ;;  %156 = vst.msk [vmem:[%s329_s1 + $0x5] ss:$8 sm:$0xf0] %vm3_vm0, %v83_v11  }
  0x88   :  { %v109_v12 = vpop.permute.xlu1 %108   ;;  %v100_v13 = vpop.permute.xlu0 %99  }
  0x89   :  { %163 = vst.msk [vmem:[%s329_s1 + $0x46] ss:$8 sm:$0xf] %vm3_vm0, %v109_v12   ;;  %164 = vst.msk [vmem:[%s329_s1 + $0x46] ss:$8 sm:$0xf0] %vm3_vm0, %v109_v12  }
  0x8a   :  { %160 = vst.msk [vmem:[%s329_s1 + $0x6] ss:$8 sm:$0xf] %vm3_vm0, %v100_v13   ;;  %161 = vst.msk [vmem:[%s329_s1 + $0x6] ss:$8 sm:$0xf0] %vm3_vm0, %v100_v13  }
  0x8c   :  { %v126_v14 = vpop.permute.xlu1 %125   ;;  %v117_v15 = vpop.permute.xlu0 %116  }
  0x8d   :  { %168 = vst.msk [vmem:[%s329_s1 + $0x47] ss:$8 sm:$0xf] %vm3_vm0, %v126_v14   ;;  %169 = vst.msk [vmem:[%s329_s1 + $0x47] ss:$8 sm:$0xf0] %vm3_vm0, %v126_v14  }
  0x8e   :  { %165 = vst.msk [vmem:[%s329_s1 + $0x7] ss:$8 sm:$0xf] %vm3_vm0, %v117_v15   ;;  %166 = vst.msk [vmem:[%s329_s1 + $0x7] ss:$8 sm:$0xf0] %vm3_vm0, %v117_v15  }

// kernel: custom-call.2
= control target key start
LH: loop header
LB: loop body
LE: loop exit
PB: predicated region body
PF: predicated region fallthrough
CT: control target
= control target key end

     0   :  { %s126_s0 = inlined_call_operand.vmem [shape: f32[2,4,16,16], index: 0, kind: input, shape index: {}]   ;;  %s127_s1 = inlined_call_operand.vmem [shape: f32[2,4,16,16], index: 1, kind: input, shape index: {}]   ;;  %s128_s2 = inlined_call_operand.hbm [shape: c64[2,4,16,16], index: 2, kind: output, shape index: {}]  }
   0x1   :  { %s87_s11 = scalar_lea.hbm %s128_s2, 2048 }
   0x2   :  { %4 = vsyncpa [#allocation0], 0  ;;  %s5_s14 = sshll.u32 %s126_s0, 4  ;;  %s6_s14 = int_to_ptr.vmem [resolvable:$true] %s5_s14 }
   0x3   :  { %s18_s15 = scalar_lea.vmem %s6_s14, 2048  ;;  %p23_p1 = scmp.lt.s32.totalorder %s6_s14, %s6_s14 }
   0x4   :  { %p19_p0 = scmp.ne.s32.totalorder %s6_s14, %s18_s15  ;;  %p24_p2 = scmp.lt.s32.totalorder %s18_s15, %s18_s15 }
   0x6   :  { %p25_p3 = por %p24_p2, %p23_p1 }
   0x8   :  { %p26_p4 = pnand %p25_p3, %p19_p0 }
   0xa   :  { %29 = shalt.err (!%p26_p4)  }
   0xb   :  { %p31_p5 = scmp.ne.s32.totalorder %s128_s2, %s87_s11  ;;  %s32_s0 = scalar_lea.hbm %s128_s2, 4096 }
   0xc   :  { %p33_p6 = scmp.lt.u32.totalorder %s32_s0, %s87_s11  ;;  %p34_p7 = scmp.lt.u32.totalorder %s87_s11, %s128_s2 }
   0xe   :  { %p35_p8 = por %p34_p7, %p33_p6 }
  0x10   :  { %p36_p9 = pnand %p35_p8, %p31_p5 }
  0x12   :  { %39 = shalt.err (!%p36_p9)  }
  0x13   :  { %8 = dma.vmem_to_hbm [thread:$0]  %s6_s14, 2048, %s128_s2, [#allocation0] }
  0x14   :  { %65 = dma.done.wait [#allocation0], 2048  }
  0x15   :  { %66 = vsyncadd [#allocation0], 4294965248 }
  0x16   :  { %10 = vsyncpa [#allocation0], 1 }
  0x17   :  { %11 = vsyncpa [#allocation1], 0  ;;  %s12_s28 = sshll.u32 %s127_s1, 4  ;;  %s13_s28 = int_to_ptr.vmem [resolvable:$true] %s12_s28 }
  0x18   :  { %s40_s29 = scalar_lea.vmem %s13_s28, 2048  ;;  %p45_p11 = scmp.lt.s32.totalorder %s13_s28, %s13_s28 }
  0x19   :  { %p41_p10 = scmp.ne.s32.totalorder %s13_s28, %s40_s29  ;;  %p46_p12 = scmp.lt.s32.totalorder %s40_s29, %s40_s29 }
  0x1b   :  { %p47_p13 = por %p46_p12, %p45_p11 }
  0x1d   :  { %p48_p0 = pnand %p47_p13, %p41_p10 }
  0x1f   :  { %51 = shalt.err (!%p48_p0)  }
  0x20   :  { %p53_p1 = scmp.ne.s32.totalorder %s87_s11, %s32_s0  ;;  %p56_p2 = scmp.lt.u32.totalorder %s32_s0, %s32_s0 }
  0x22   :  { %p57_p3 = por %p56_p2, %p34_p7 }
  0x24   :  { %p59_p4 = por %p57_p3, %p33_p6 }
  0x26   :  { %p60_p5 = pnand %p59_p4, %p53_p1 }
  0x28   :  { %63 = shalt.err (!%p60_p5)  }
  0x29   :  { %15 = dma.vmem_to_hbm [thread:$0]  %s13_s28, 2048, %s87_s11, [#allocation1] }
  0x2a   :  { %67 = dma.done.wait [#allocation1], 2048  }
  0x2b   :  { %68 = vsyncadd [#allocation1], 4294965248 }
  0x2c   :  { %17 = vsyncpa [#allocation1], 1 }

// kernel: modrelu.2
= control target key start
LH: loop header
LB: loop body
LE: loop exit
PB: predicated region body
PF: predicated region fallthrough
CT: control target
= control target key end

     0   :  { %s202_s0 = inlined_call_operand.vmem [shape: f32[1,16,128], index: 0, kind: input, shape index: {}]   ;;  %s203_s1 = inlined_call_operand.<no memory space> [shape: f32[], index: 1, kind: input, shape index: {}]   ;;  %s204_s2 = inlined_call_operand.vmem [shape: f32[1,16,128], index: 2, kind: input, shape index: {}]   ;;  %s205_s3 = inlined_call_operand.vmem [shape: f32[2,16,128], index: 3, kind: output, shape index: {}]  }
   0x1   :  { %v8_v0 = vstv %s203_s1  ;;  %v52_v1 = vld [vmem:[%s202_s0] sm:$0xff]  ;;  %v143_v3 = vld [vmem:[%s202_s0 + $0x8] sm:$0xff] }
   0x2   :  { %v53_v2 = vld [vmem:[%s204_s2] sm:$0xff]  ;;  %v144_v5 = vld [vmem:[%s204_s2 + $0x8] sm:$0xff]  ;;  %v76_v6 = vmax.f32 %v8_v0, %v52_v1  ;;  %v84_v7 = vmax.f32 %v8_v0, %v143_v3 }
   0x3   :  { %v56_v4 = vmax.f32 %v53_v2, %v8_v0  ;;  %v69_v8 = vmax.f32 %v144_v5, %v8_v0 }
   0x4   :  { %v96_v10 = vmul.f32 %v76_v6, %v76_v6  ;;  %v97_v11 = vmul.f32 %v84_v7, %v84_v7 }
   0x5   :  { %v94_v9 = vmul.f32 %v56_v4, %v56_v4  ;;  %v95_v12 = vmul.f32 %v69_v8, %v69_v8 }
   0x7   :  { %v98_v13 = vadd.f32 %v96_v10, %v94_v9  ;;  %v99_v14 = vadd.f32 %v97_v11, %v95_v12 }
   0x9   :  { %147 = vrsqrt.f32 %v98_v13  ;;  %vm102_vm0 = vcmp.eq.f32.partialorder %v98_v13, inf  ;;  %v105_v16 = vand.u32 2147483648, %v98_v13  ;;  %vm104_vm1 = vcmp.eq.f32.partialorder %v98_v13, 0.0 }
   0xa   :  { %149 = vrsqrt.f32 %v99_v14  ;;  %vm109_vm2 = vcmp.eq.f32.partialorder %v99_v14, inf  ;;  %v112_v19 = vand.u32 2147483648, %v99_v14  ;;  %vm111_vm3 = vcmp.eq.f32.partialorder %v99_v14, 0.0 }
  0x13   :  { %v148_v15 = vpop.eup %147 }
  0x14   :  { %v150_v17 = vpop.eup %149  ;;  %v101_v18 = vmul.f32 %v148_v15, %v98_v13 }
  0x15   :  { %v108_v20 = vmul.f32 %v150_v17, %v99_v14 }
  0x16   :  { %v103_v21 = vsel %vm102_vm0, %v98_v13, %v101_v18 }
  0x17   :  { %v106_v22 = vsel %vm104_vm1, %v105_v16, %v103_v21  ;;  %v110_v23 = vsel %vm109_vm2, %v99_v14, %v108_v20 }
  0x18   :  { %v113_v24 = vsel %vm111_vm3, %v112_v19, %v110_v23  ;;  %v118_v25 = vadd.f32 1e-08, %v106_v22  ;;  %v114_v27 = vadd.f32 -0.1, %v106_v22 }
  0x19   :  { %v119_v26 = vadd.f32 1e-08, %v113_v24  ;;  %v115_v28 = vadd.f32 -0.1, %v113_v24 }
  0x1a   :  { %151 = vrcp.f32 %v118_v25  ;;  %v116_v29 = vmax.f32 %v114_v27, 0.0 }
  0x1b   :  { %153 = vrcp.f32 %v119_v26  ;;  %v117_v30 = vmax.f32 %v115_v28, 0.0 }
  0x24   :  { %v152_v31 = vpop.eup %151 }
  0x25   :  { %v154_v32 = vpop.eup %153  ;;  %v121_v33 = vmul.f32 %v152_v31, %v116_v29 }
  0x26   :  { %v123_v34 = vmul.f32 %v154_v32, %v117_v30 }
  0x27   :  { %v124_v35 = vmul.f32 %v121_v33, %v56_v4  ;;  %v128_v36 = vmul.f32 %v121_v33, %v76_v6 }
  0x28   :  { %v125_v37 = vmul.f32 %v123_v34, %v69_v8  ;;  %v129_v38 = vmul.f32 %v123_v34, %v84_v7 }
  0x29   :  { %126 = vst [vmem:[%s205_s3] sm:$0xff] %v124_v35  ;;  %145 = vst [vmem:[%s205_s3 + $0x10] sm:$0xff] %v128_v36 }
  0x2a   :  { %127 = vst [vmem:[%s205_s3 + $0x8] sm:$0xff] %v125_v37  ;;  %146 = vst [vmem:[%s205_s3 + $0x18] sm:$0xff] %v129_v38 }

</bundles_post_ra>
